<compile_context>
chip_gen: v5e
topology: v5e:2x2
jax: 0.10.0
libtpu: 0.0.40
codegen_flags: <defaults>
</compile_context>

<pallas_src>
import jax
import jax.numpy as jnp
from jax.experimental import pallas as pl
from jax.experimental.pallas import tpu as pltpu


def _ibp_rowloss_kernel(x_ref, yoh_ref, w1_ref, b1_ref, std1_ref,
                        w2_ref, b2_ref, absw2_ref, out_ref):
    """One batch tile: IBP forward + worst-case CE; writes per-row NLL column."""
    x = x_ref[...].astype(jnp.float32)          # [TB, D]  (== mu of [x-eps, x+eps])
    yoh = yoh_ref[...].astype(jnp.float32)      # [TB, C]  hard one-hot; all-zero = pad

    # ---- layer 1: interval affine + ReLU ------------------------------------
    # input half-width is eps everywhere => std1 = eps * colsum(|w1|), a [1,H]
    # vector precomputed in the wrapper (loop-invariant, resident in VMEM).
    mu1 = jnp.dot(x.astype(w1_ref.dtype), w1_ref[...],
                  preferred_element_type=jnp.float32) + b1_ref[...]
    std1 = std1_ref[...]                        # [1, H], broadcast over batch
    lb1 = jnp.maximum(mu1 - std1, 0.0)          # ReLU(lower)
    ub1 = jnp.maximum(mu1 + std1, 0.0)          # ReLU(upper)

    # ---- layer 2: interval affine via two matmuls ----------------------------
    mu2 = (lb1 + ub1) * 0.5
    std2 = (ub1 - lb1) * 0.5
    mu_out = jnp.dot(mu2.astype(w2_ref.dtype), w2_ref[...],
                     preferred_element_type=jnp.float32) + b2_ref[...]
    std_out = jnp.dot(std2.astype(absw2_ref.dtype), absw2_ref[...],
                      preferred_element_type=jnp.float32)

    # ---- worst-case logits: lower bound at the true class, upper elsewhere ---
    lb = mu_out - std_out
    ub = mu_out + std_out
    wc = jnp.where(yoh > 0.5, lb, ub)           # exact match to reference select

    # ---- per-row cross entropy (stable log-softmax); pad rows contribute 0 ---
    m = jnp.max(wc, axis=-1, keepdims=True)
    lse = m + jnp.log(jnp.sum(jnp.exp(wc - m), axis=-1, keepdims=True))
    valid = jnp.sum(yoh, axis=-1, keepdims=True)            # 1 real row, 0 pad row
    nll = lse - jnp.sum(wc * yoh, axis=-1, keepdims=True)   # [TB, 1]
    out_ref[...] = nll * valid


def ibp_adversarial_loss(x, y_onehot, w1, b1, w2, b2, eps, *, tb=128,
                         use_bf16=False):
    """Gridded over the batch ("parallel"); weights resident; mean taken in XLA."""
    B, D = x.shape
    C = y_onehot.shape[1]
    H = w1.shape[1]

    # Loop-invariant prep done once in XLA (not per grid step in the kernel).
    w1_f32 = w1.astype(jnp.float32)
    w2_f32 = w2.astype(jnp.float32)
    std1 = eps * jnp.sum(jnp.abs(w1_f32), axis=0, keepdims=True)   # [1, H]
    absw2 = jnp.abs(w2_f32)                                        # [H, C]
    b1 = b1.astype(jnp.float32).reshape(1, H)
    b2 = b2.astype(jnp.float32).reshape(1, C)

    if use_bf16:
        # bf16 MXU operands, f32 accumulation.  NOTE: bf16-rounded IBP bounds
        # are not strictly sound (the interval can shrink); default stays f32.
        w1_in = w1_f32.astype(jnp.bfloat16)
        w2_in = w2_f32.astype(jnp.bfloat16)
        absw2_in = absw2.astype(jnp.bfloat16)
    else:
        w1_in, w2_in, absw2_in = w1_f32, w2_f32, absw2

    # Tile sizing: big tiles amortize per-step overhead and fill the MXU M dim;
    # shrink to a single minimally-padded tile when the batch is small.
    tb = max(8, (tb // 8) * 8)
    if B <= tb:
        tb = -(-B // 8) * 8
    nt = -(-B // tb)                 # ceil-div
    Bp = nt * tb
    if Bp != B:                      # pad batch; padded rows get all-zero one-hot
        x = jnp.pad(x, ((0, Bp - B), (0, 0)))
        y_onehot = jnp.pad(y_onehot, ((0, Bp - B), (0, 0)))

    grid_spec = pltpu.PrefetchScalarGridSpec(
        num_scalar_prefetch=0,
        grid=(nt,),
        in_specs=[
            pl.BlockSpec((tb, D), lambda i: (i, 0)),   # x tile        (pipelined)
            pl.BlockSpec((tb, C), lambda i: (i, 0)),   # one-hot tile  (pipelined)
            pl.BlockSpec((D, H), lambda i: (0, 0)),    # w1            (resident)
            pl.BlockSpec((1, H), lambda i: (0, 0)),    # b1            (resident)
            pl.BlockSpec((1, H), lambda i: (0, 0)),    # eps*colsum|w1| (resident)
            pl.BlockSpec((H, C), lambda i: (0, 0)),    # w2            (resident)
            pl.BlockSpec((1, C), lambda i: (0, 0)),    # b2            (resident)
            pl.BlockSpec((H, C), lambda i: (0, 0)),    # |w2|          (resident)
        ],
        out_specs=pl.BlockSpec((tb, 1), lambda i: (i, 0)),   # per-row NLL
    )

    per_row = pl.pallas_call(
        _ibp_rowloss_kernel,
        out_shape=jax.ShapeDtypeStruct((Bp, 1), jnp.float32),
        grid_spec=grid_spec,
        compiler_params=pltpu.CompilerParams(
            dimension_semantics=("parallel",)),   # no carried state -> megacore OK
    )(x, y_onehot, w1_in, b1, std1, w2_in, b2, absw2_in)

    # mean reduction of CrossEntropyLoss, done in the wrapper (XLA).
    return jnp.sum(per_row[:B, 0]) / B


def ibp_adversarial_loss_ref(x, y_onehot, w1, b1, w2, b2, eps):
    """Pure-JAX reference mirroring the PyTorch semantics exactly."""
    x = x.astype(jnp.float32)
    z_inf, z_sup = x - eps, x + eps
    mu, std = (z_inf + z_sup) / 2, (z_sup - z_inf) / 2
    mu1 = mu @ w1 + b1
    std1 = std @ jnp.abs(w1)
    lb1, ub1 = jnp.maximum(mu1 - std1, 0), jnp.maximum(mu1 + std1, 0)
    mu2, std2 = (lb1 + ub1) / 2, (ub1 - lb1) / 2
    mu_out = mu2 @ w2 + b2
    std_out = std2 @ jnp.abs(w2)
    lb, ub = mu_out - std_out, mu_out + std_out
    wc = jnp.where(y_onehot > 0.5, lb, ub)
    logz = jax.nn.logsumexp(wc, axis=-1)
    logp = jnp.sum(wc * y_onehot, axis=-1) - logz
    return -jnp.mean(logp)


if __name__ == "__main__":
    # B=300 deliberately not a multiple of tb=128 so the multi-tile grid (3 tiles)
    # and the padding/masking path are both exercised.
    B, D, H, C = 300, 32, 64, 8
    eps = 0.1

    key = jax.random.PRNGKey(0)
    kx, ky, kw1, kb1, kw2, kb2 = jax.random.split(key, 6)

    x = jax.random.normal(kx, (B, D), dtype=jnp.float32)
    y = jax.random.randint(ky, (B,), 0, C)
    y_onehot = jax.nn.one_hot(y, C, dtype=jnp.float32)

    # Weights stored pre-transposed ([in, out]) so the kernel does row-major matmuls
    # (equivalent to the PyTorch `mu @ weights.T`).
    w1 = jax.random.normal(kw1, (D, H), dtype=jnp.float32) * (1.0 / jnp.sqrt(D))
    b1 = jax.random.normal(kb1, (1, H), dtype=jnp.float32) * 0.05
    w2 = jax.random.normal(kw2, (H, C), dtype=jnp.float32) * (1.0 / jnp.sqrt(H))
    b2 = jax.random.normal(kb2, (1, C), dtype=jnp.float32) * 0.05

    ref = ibp_adversarial_loss_ref(x, y_onehot, w1, b1, w2, b2, eps)

    # f32 path (default): exact-semantics IBP, tight tolerance.
    loss = ibp_adversarial_loss(x, y_onehot, w1, b1, w2, b2, eps, tb=128)
    jax.block_until_ready(loss)
    assert jnp.allclose(loss, ref, rtol=1e-4, atol=1e-4), (loss, ref)

    # Optional bf16-MXU path: same kernel, halved weight DMA, loose tolerance.
    loss_bf16 = ibp_adversarial_loss(x, y_onehot, w1, b1, w2, b2, eps, tb=128,
                                     use_bf16=True)
    jax.block_until_ready(loss_bf16)
    assert jnp.allclose(loss_bf16, ref, rtol=3e-2, atol=5e-2), (loss_bf16, ref)

    print("KERNEL_OK")
</pallas_src>

<mosaic_0001>
module attributes {stable_mosaic.version = 11 : i64} {
  func.func @_ibp_rowloss_kernel(%arg0: i32, %arg1: memref<128x32xf32, #tpu.memory_space<vmem>>, %arg2: memref<128x8xf32, #tpu.memory_space<vmem>>, %arg3: memref<32x64xf32, #tpu.memory_space<vmem>>, %arg4: memref<1x64xf32, #tpu.memory_space<vmem>>, %arg5: memref<1x64xf32, #tpu.memory_space<vmem>>, %arg6: memref<64x8xf32, #tpu.memory_space<vmem>>, %arg7: memref<1x8xf32, #tpu.memory_space<vmem>>, %arg8: memref<64x8xf32, #tpu.memory_space<vmem>>, %arg9: memref<128x1xf32, #tpu.memory_space<vmem>>) attributes {dimension_semantics = [#tpu.dimension_semantics<parallel>], iteration_bounds = array<i64: 3>, scalar_prefetch = 0 : i64, scratch_operands = 0 : i64, tpu.core_type = #tpu.core_type<tc>, window_params = [{transform_indices = @transform_0, window_bounds = array<i64: 128, 32>}, {transform_indices = @transform_1, window_bounds = array<i64: 128, 8>}, {pipeline_mode = #tpu.pipeline_mode<synchronous>, transform_indices = @transform_2, window_bounds = array<i64: 32, 64>}, {pipeline_mode = #tpu.pipeline_mode<synchronous>, transform_indices = @transform_3, window_bounds = array<i64: 1, 64>}, {pipeline_mode = #tpu.pipeline_mode<synchronous>, transform_indices = @transform_4, window_bounds = array<i64: 1, 64>}, {pipeline_mode = #tpu.pipeline_mode<synchronous>, transform_indices = @transform_5, window_bounds = array<i64: 64, 8>}, {pipeline_mode = #tpu.pipeline_mode<synchronous>, transform_indices = @transform_6, window_bounds = array<i64: 1, 8>}, {pipeline_mode = #tpu.pipeline_mode<synchronous>, transform_indices = @transform_7, window_bounds = array<i64: 64, 8>}, {transform_indices = @transform_8, window_bounds = array<i64: 128, 1>}]} {
    %c0 = arith.constant 0 : index
    %c0_0 = arith.constant 0 : index
    %0 = vector.load %arg1[%c0, %c0_0] : memref<128x32xf32, #tpu.memory_space<vmem>>, vector<128x32xf32>
    %c0_1 = arith.constant 0 : index
    %c0_2 = arith.constant 0 : index
    %1 = vector.load %arg2[%c0_1, %c0_2] : memref<128x8xf32, #tpu.memory_space<vmem>>, vector<128x8xf32>
    %c0_3 = arith.constant 0 : index
    %c0_4 = arith.constant 0 : index
    %2 = vector.load %arg3[%c0_3, %c0_4] : memref<32x64xf32, #tpu.memory_space<vmem>>, vector<32x64xf32>
    %cst = arith.constant dense<0.000000e+00> : vector<128x64xf32>
    %3 = tpu.matmul %0, %2, %cst {dimension_numbers = #tpu.dot_dimension_numbers<[1], [0], [0], [1], [0, 0, 1, 1], [], []>} : vector<128x32xf32>, vector<32x64xf32>, vector<128x64xf32> -> vector<128x64xf32>
    %c0_5 = arith.constant 0 : index
    %c0_6 = arith.constant 0 : index
    %4 = vector.load %arg4[%c0_5, %c0_6] : memref<1x64xf32, #tpu.memory_space<vmem>>, vector<1x64xf32>
    %5 = vector.broadcast %4 : vector<1x64xf32> to vector<128x64xf32>
    %6 = arith.addf %3, %5 : vector<128x64xf32>
    %c0_7 = arith.constant 0 : index
    %c0_8 = arith.constant 0 : index
    %7 = vector.load %arg5[%c0_7, %c0_8] : memref<1x64xf32, #tpu.memory_space<vmem>>, vector<1x64xf32>
    %8 = vector.broadcast %7 : vector<1x64xf32> to vector<128x64xf32>
    %9 = arith.subf %6, %8 : vector<128x64xf32>
    %cst_9 = arith.constant 0.000000e+00 : f32
    %10 = vector.broadcast %cst_9 : f32 to vector<128x64xf32>
    %11 = arith.maximumf %9, %10 : vector<128x64xf32>
    %12 = vector.broadcast %7 : vector<1x64xf32> to vector<128x64xf32>
    %13 = arith.addf %6, %12 : vector<128x64xf32>
    %cst_10 = arith.constant 0.000000e+00 : f32
    %14 = vector.broadcast %cst_10 : f32 to vector<128x64xf32>
    %15 = arith.maximumf %13, %14 : vector<128x64xf32>
    %16 = arith.addf %11, %15 : vector<128x64xf32>
    %cst_11 = arith.constant 5.000000e-01 : f32
    %17 = vector.broadcast %cst_11 : f32 to vector<128x64xf32>
    %18 = arith.mulf %16, %17 : vector<128x64xf32>
    %19 = arith.subf %15, %11 : vector<128x64xf32>
    %cst_12 = arith.constant 5.000000e-01 : f32
    %20 = vector.broadcast %cst_12 : f32 to vector<128x64xf32>
    %21 = arith.mulf %19, %20 : vector<128x64xf32>
    %c0_13 = arith.constant 0 : index
    %c0_14 = arith.constant 0 : index
    %22 = vector.load %arg6[%c0_13, %c0_14] : memref<64x8xf32, #tpu.memory_space<vmem>>, vector<64x8xf32>
    %cst_15 = arith.constant dense<0.000000e+00> : vector<128x8xf32>
    %23 = tpu.matmul %18, %22, %cst_15 {dimension_numbers = #tpu.dot_dimension_numbers<[1], [0], [0], [1], [0, 0, 1, 1], [], []>} : vector<128x64xf32>, vector<64x8xf32>, vector<128x8xf32> -> vector<128x8xf32>
    %c0_16 = arith.constant 0 : index
    %c0_17 = arith.constant 0 : index
    %24 = vector.load %arg7[%c0_16, %c0_17] : memref<1x8xf32, #tpu.memory_space<vmem>>, vector<1x8xf32>
    %25 = vector.broadcast %24 : vector<1x8xf32> to vector<128x8xf32>
    %26 = arith.addf %23, %25 : vector<128x8xf32>
    %c0_18 = arith.constant 0 : index
    %c0_19 = arith.constant 0 : index
    %27 = vector.load %arg8[%c0_18, %c0_19] : memref<64x8xf32, #tpu.memory_space<vmem>>, vector<64x8xf32>
    %cst_20 = arith.constant dense<0.000000e+00> : vector<128x8xf32>
    %28 = tpu.matmul %21, %27, %cst_20 {dimension_numbers = #tpu.dot_dimension_numbers<[1], [0], [0], [1], [0, 0, 1, 1], [], []>} : vector<128x64xf32>, vector<64x8xf32>, vector<128x8xf32> -> vector<128x8xf32>
    %29 = arith.subf %26, %28 : vector<128x8xf32>
    %30 = arith.addf %26, %28 : vector<128x8xf32>
    %cst_21 = arith.constant 5.000000e-01 : f32
    %31 = vector.broadcast %cst_21 : f32 to vector<128x8xf32>
    %32 = arith.cmpf ogt, %1, %31 : vector<128x8xf32>
    %33 = arith.select %32, %29, %30 : vector<128x8xi1>, vector<128x8xf32>
    %cst_22 = arith.constant dense<0xFF800000> : vector<128xf32>
    %34 = vector.multi_reduction <maximumf>, %33, %cst_22 [1] : vector<128x8xf32> to vector<128xf32>
    %35 = vector.shape_cast %34 : vector<128xf32> to vector<128x1xf32>
    %36 = vector.broadcast %35 : vector<128x1xf32> to vector<128x8xf32>
    %37 = arith.subf %33, %36 : vector<128x8xf32>
    %38 = math.exp %37 : vector<128x8xf32>
    %cst_23 = arith.constant dense<0.000000e+00> : vector<128xf32>
    %39 = vector.multi_reduction <add>, %38, %cst_23 [1] : vector<128x8xf32> to vector<128xf32>
    %40 = vector.shape_cast %39 : vector<128xf32> to vector<128x1xf32>
    %41 = math.log %40 : vector<128x1xf32>
    %42 = arith.addf %35, %41 : vector<128x1xf32>
    %cst_24 = arith.constant dense<0.000000e+00> : vector<128xf32>
    %43 = vector.multi_reduction <add>, %1, %cst_24 [1] : vector<128x8xf32> to vector<128xf32>
    %44 = vector.shape_cast %43 : vector<128xf32> to vector<128x1xf32>
    %45 = arith.mulf %33, %1 : vector<128x8xf32>
    %cst_25 = arith.constant dense<0.000000e+00> : vector<128xf32>
    %46 = vector.multi_reduction <add>, %45, %cst_25 [1] : vector<128x8xf32> to vector<128xf32>
    %47 = vector.shape_cast %46 : vector<128xf32> to vector<128x1xf32>
    %48 = arith.subf %42, %47 : vector<128x1xf32>
    %49 = arith.mulf %48, %44 : vector<128x1xf32>
    %c0_26 = arith.constant 0 : index
    %c0_27 = arith.constant 0 : index
    %50 = vector.load %arg9[%c0_26, %c0_27] : memref<128x1xf32, #tpu.memory_space<vmem>>, vector<128x1xf32>
    tpu.vector_store %arg9[%c0_26, %c0_27], %49 {strides = array<i32>} : memref<128x1xf32, #tpu.memory_space<vmem>>, vector<128x1xf32>,
    return
  }
  func.func @transform_0(%arg0: i32) -> (i32, i32) {
    %c0_i32 = arith.constant 0 : i32
    %c0_i32_0 = arith.constant 0 : i32
    return %arg0, %c0_i32 : i32, i32
  }
  func.func @transform_1(%arg0: i32) -> (i32, i32) {
    %c0_i32 = arith.constant 0 : i32
    %c0_i32_0 = arith.constant 0 : i32
    return %arg0, %c0_i32 : i32, i32
  }
  func.func @transform_2(%arg0: i32) -> (i32, i32) {
    %c0_i32 = arith.constant 0 : i32
    %c0_i32_0 = arith.constant 0 : i32
    %c0_i32_1 = arith.constant 0 : i32
    return %c0_i32, %c0_i32_0 : i32, i32
  }
  func.func @transform_3(%arg0: i32) -> (i32, i32) {
    %c0_i32 = arith.constant 0 : i32
    %c0_i32_0 = arith.constant 0 : i32
    %c0_i32_1 = arith.constant 0 : i32
    return %c0_i32, %c0_i32_0 : i32, i32
  }
  func.func @transform_4(%arg0: i32) -> (i32, i32) {
    %c0_i32 = arith.constant 0 : i32
    %c0_i32_0 = arith.constant 0 : i32
    %c0_i32_1 = arith.constant 0 : i32
    return %c0_i32, %c0_i32_0 : i32, i32
  }
  func.func @transform_5(%arg0: i32) -> (i32, i32) {
    %c0_i32 = arith.constant 0 : i32
    %c0_i32_0 = arith.constant 0 : i32
    %c0_i32_1 = arith.constant 0 : i32
    return %c0_i32, %c0_i32_0 : i32, i32
  }
  func.func @transform_6(%arg0: i32) -> (i32, i32) {
    %c0_i32 = arith.constant 0 : i32
    %c0_i32_0 = arith.constant 0 : i32
    %c0_i32_1 = arith.constant 0 : i32
    return %c0_i32, %c0_i32_0 : i32, i32
  }
  func.func @transform_7(%arg0: i32) -> (i32, i32) {
    %c0_i32 = arith.constant 0 : i32
    %c0_i32_0 = arith.constant 0 : i32
    %c0_i32_1 = arith.constant 0 : i32
    return %c0_i32, %c0_i32_0 : i32, i32
  }
  func.func @transform_8(%arg0: i32) -> (i32, i32) {
    %c0_i32 = arith.constant 0 : i32
    %c0_i32_0 = arith.constant 0 : i32
    return %arg0, %c0_i32 : i32, i32
  }
}

</mosaic_0001>

<bundles_post_ra>
// kernel: tpu_custom_call.1
= control target key start
LH: loop header
LB: loop body
LE: loop exit
PB: predicated region body
PF: predicated region fallthrough
CT: control target
= control target key end

     0   :  { %s1559_s27 = smov 0   ;;  %s2195_s0 = inlined_call_operand.vmem [shape: f32[384,32], index: 0, kind: input, shape index: {}]   ;;  %s2196_s1 = inlined_call_operand.vmem [shape: f32[384,8], index: 1, kind: input, shape index: {}]   ;;  %s2197_s2 = inlined_call_operand.vmem [shape: f32[32,64], index: 2, kind: input, shape index: {}]   ;;  %s2198_s3 = inlined_call_operand.vmem [shape: f32[1,64], index: 3, kind: input, shape index: {}]   ;;  %s2199_s4 = inlined_call_operand.vmem [shape: f32[1,64], index: 4, kind: input, shape index: {}]   ;;  %s2200_s5 = inlined_call_operand.vmem [shape: f32[64,8], index: 5, kind: input, shape index: {}]   ;;  %s2201_s6 = inlined_call_operand.vmem [shape: f32[1,8], index: 6, kind: input, shape index: {}]   ;;  %s2202_s7 = inlined_call_operand.vmem [shape: f32[64,8], index: 7, kind: input, shape index: {}]   ;;  %s2203_s8 = inlined_call_operand.vmem [shape: f32[384,1], index: 8, kind: output, shape index: {}]  }
   0x1 LB: > { %s1350_s28 = sadd.s32 4294967295, %s1512_s27   ;;  %p1354_p0 = scmp.ge.s32.totalorder %s1512_s27, 1  ;;  %s1512_s27 = sphi %s1559_s27, %s18_s27  }
   0x2   : > { %p274_p1 = scmp.lt.s32.totalorder %s1512_s27, 4 }
   0x4   : > { %p275_p2 = pnand %p1354_p0, %p274_p1 }
   0x5   : > { %s1355_s11 = sshll.u32 (!%p275_p2), %s1350_s28, 4 }
   0x6   : > { %278 = sbr.rel (%p275_p2) target bundleno = 710 (0x2c6), region = 52  ;;  %p314_p3 = scmp.lt.s32.totalorder (!%p275_p2), %s1355_s11, 47 }
   0xb   : > { %v366_v0 = vld [vmem:[%s2197_s2 + $0x18] sm:$0xff]  ;;  %v365_v1 = vld [vmem:[%s2197_s2 + $0x10] sm:$0xff]  ;;  %v364_v2 = vld [vmem:[%s2197_s2 + $0x8] sm:$0xff]  ;;  %s2205_s11 = smov (!%p314_p3, %s1355_s11), 47  ;;  %vm371_vm0 = vcmask 261120   ;;  %vm629_vm1 = vcmask 523264  }
   0xc   : > { %432 = vmatpush.msra.mxu0 %v366_v0  ;;  %1411 = vmatpush.msra.mxu3 %v366_v0  ;;  %v363_v3 = vld [vmem:[%s2197_s2] sm:$0xff]  ;;  %s1579_s16 = sshll.u32 %s2205_s11, 3  ;;  %v624_v14 = vld [vmem:[%s2200_s5 + $0x38] sm:$0xff]  ;;  %v623_v16 = vld [vmem:[%s2200_s5 + $0x30] sm:$0xff]  ;;  %vm928_vm2 = vcmask 64512  }
   0xd   : > { %s1585_s19 = scalar_lea.vmem %s2195_s0, %s1579_s16  ;;  %v750_v15 = vld [vmem:[%s2202_s7 + $0x38] sm:$0xff]  ;;  %686 = vmatpush.msra.mxu1 %v624_v14  ;;  %v749_v17 = vld [vmem:[%s2202_s7 + $0x30] sm:$0xff]  ;;  %v622_v23 = vld [vmem:[%s2200_s5 + $0x28] sm:$0xff]  ;;  %s1724_s18 = scalar_lea.vmem %s2196_s1, %s1579_s16 }
   0xe   : > { %433 = vmatpush.msra.mxu0 %v365_v1  ;;  %1412 = vmatpush.msra.mxu3 %v365_v1  ;;  %v331_v4 = vld [vmem:[%s1585_s19] sm:$0xff]  ;;  %v332_v5 = vld [vmem:[%s1585_s19 + $0x8] sm:$0xff]  ;;  %v333_v6 = vld [vmem:[%s1585_s19 + $0x10] sm:$0xff]  ;;  %s2091_s23 = scalar_lea.vmem %s2203_s8, %s1579_s16 }
   0xf   : > { %v334_v7 = vld [vmem:[%s1585_s19 + $0x18] sm:$0xff]  ;;  %v335_v8 = vld [vmem:[%s1585_s19 + $0x20] sm:$0xff]  ;;  %v336_v9 = vld [vmem:[%s1585_s19 + $0x28] sm:$0xff]  ;;  %807 = vmatpush.msra.mxu2 %v750_v15  ;;  %687 = vmatpush.msra.mxu1 %v623_v16 }
  0x10   : > { %434 = vmatpush.msra.mxu0 %v364_v2  ;;  %1413 = vmatpush.msra.mxu3 %v364_v2  ;;  %v337_v10 = vld [vmem:[%s1585_s19 + $0x30] sm:$0xff]  ;;  %v338_v11 = vld [vmem:[%s1585_s19 + $0x38] sm:$0xff]  ;;  %v339_v12 = vld [vmem:[%s1585_s19 + $0x40] sm:$0xff] }
  0x11   : > { %v344_v13 = vld [vmem:[%s1585_s19 + $0x68] sm:$0xff]  ;;  %808 = vmatpush.msra.mxu2 %v749_v17  ;;  %v345_v19 = vld [vmem:[%s1585_s19 + $0x70] sm:$0xff]  ;;  %v346_v21 = vld [vmem:[%s1585_s19 + $0x78] sm:$0xff]  ;;  %688 = vmatpush.msra.mxu1 %v622_v23 }
  0x12   : > { %435 = vmatpush.msra.mxu0 %v363_v3  ;;  %1414 = vmatpush.msra.mxu3 %v363_v3  ;;  %v340_v18 = vld [vmem:[%s1585_s19 + $0x48] sm:$0xff]  ;;  %v341_v20 = vld [vmem:[%s1585_s19 + $0x50] sm:$0xff]  ;;  %v342_v22 = vld [vmem:[%s1585_s19 + $0x58] sm:$0xff] }
  0x13   : > { %1361 = vmatmul.msk.f32.vlgmr.msra.gmra.mxu0 %vm371_vm0, %v331_v4  ;;  %1374 = vmatmul.msk.f32.vlgmr.msra.gmra.mxu3 %vm371_vm0, %v344_v13  ;;  %v748_v24 = vld [vmem:[%s2202_s7 + $0x28] sm:$0xff]  ;;  %v343_v25 = vld [vmem:[%s1585_s19 + $0x60] sm:$0xff]  ;;  %v620_v28 = vld [vmem:[%s2200_s5 + $0x18] sm:$0xff] }
  0x14   : > { %1415 = vmatpush.msrb.mxu3 %v624_v14  ;;  %809 = vmatpush.msra.mxu2 %v748_v24  ;;  %v621_v26 = vld [vmem:[%s2200_s5 + $0x20] sm:$0xff]  ;;  %v746_v29 = vld [vmem:[%s2202_s7 + $0x18] sm:$0xff]  ;;  %v619_v30 = vld [vmem:[%s2200_s5 + $0x10] sm:$0xff] }
  0x15   : > { %v747_v27 = vld [vmem:[%s2202_s7 + $0x20] sm:$0xff]  ;;  %689 = vmatpush.msra.mxu1 %v621_v26  ;;  %v745_v31 = vld [vmem:[%s2202_s7 + $0x10] sm:$0xff]  ;;  %v618_v32 = vld [vmem:[%s2200_s5 + $0x8] sm:$0xff] }
  0x16   : > { %1416 = vmatpush.msrb.mxu3 %v623_v16  ;;  %810 = vmatpush.msra.mxu2 %v747_v27  ;;  %v744_v33 = vld [vmem:[%s2202_s7 + $0x8] sm:$0xff]  ;;  %v617_v34 = vld [vmem:[%s2200_s5] sm:$0xff] }
  0x17   : > { %690 = vmatpush.msra.mxu1 %v620_v28  ;;  %v743_v35 = vld [vmem:[%s2202_s7] sm:$0xff] }
  0x18   : > { %1417 = vmatpush.msrb.mxu3 %v622_v23  ;;  %811 = vmatpush.msra.mxu2 %v746_v29  ;;  %v1670_v36 = vld [vmem:[%s2198_s3] ss:$0 sm:$0xff] }
  0x19   : > { %691 = vmatpush.msra.mxu1 %v619_v30  ;;  %v1675_v37 = vld [vmem:[%s2199_s4] ss:$0 sm:$0xff] }
  0x1a   : > { %1418 = vmatpush.msrb.mxu3 %v621_v26  ;;  %812 = vmatpush.msra.mxu2 %v745_v31 }
  0x1b   : > { %1362 = vmatmul.msk.f32.gmra.mxu0 %vm371_vm0, %v332_v5  ;;  %1375 = vmatmul.msk.f32.gmra.mxu3 %vm371_vm0, %v345_v19 }
  0x1c   : > { %1419 = vmatpush.msrb.mxu3 %v620_v28  ;;  %692 = vmatpush.msra.mxu1 %v618_v32 }
  0x1d   : > { %813 = vmatpush.msra.mxu2 %v744_v33 }
  0x1e   : > { %1420 = vmatpush.msrb.mxu3 %v619_v30  ;;  %693 = vmatpush.msra.mxu1 %v617_v34 }
  0x1f   : > { %814 = vmatpush.msra.mxu2 %v743_v35 }
  0x20   : > { %1421 = vmatpush.msrb.mxu3 %v618_v32 }
  0x22   : > { %1422 = vmatpush.msrb.mxu3 %v617_v34 }
  0x23   : > { %1363 = vmatmul.msk.f32.gmra.mxu0 %vm371_vm0, %v333_v6  ;;  %1376 = vmatmul.msk.f32.gmra.mxu3 %vm371_vm0, %v346_v21 }
  0x24   : > { %1423 = vmatpush.msra.mxu3 %v750_v15 }
  0x26   : > { %1424 = vmatpush.msra.mxu3 %v749_v17 }
  0x28   : > { %1425 = vmatpush.msra.mxu3 %v748_v24 }
  0x2a   : > { %1426 = vmatpush.msra.mxu3 %v747_v27 }
  0x2b   : > { %1364 = vmatmul.msk.f32.gmra.mxu0 %vm371_vm0, %v334_v7 }
  0x2c   : > { %1427 = vmatpush.msra.mxu3 %v746_v29 }
  0x2e   : > { %1428 = vmatpush.msra.mxu3 %v745_v31 }
  0x30   : > { %1429 = vmatpush.msra.mxu3 %v744_v33 }
  0x32   : > { %1430 = vmatpush.msra.mxu3 %v743_v35 }
  0x33   : > { %1365 = vmatmul.msk.f32.gmra.mxu0 %vm371_vm0, %v335_v8 }
  0x3b   : > { %1366 = vmatmul.msk.f32.gmra.mxu0 %vm371_vm0, %v336_v9 }
  0x43   : > { %1367 = vmatmul.msk.f32.gmra.mxu0 %vm371_vm0, %v337_v10 }
  0x4b   : > { %1368 = vmatmul.msk.f32.gmra.mxu0 %vm371_vm0, %v338_v11 }
  0x53   : > { %1369 = vmatmul.msk.f32.gmra.mxu0 %vm371_vm0, %v339_v12 }
  0x5b   : > { %1370 = vmatmul.msk.f32.gmra.mxu0 %vm371_vm0, %v340_v18 }
  0x63   : > { %1371 = vmatmul.msk.f32.gmra.mxu0 %vm371_vm0, %v341_v20 }
  0x6b   : > { %1372 = vmatmul.msk.f32.gmra.mxu0 %vm371_vm0, %v342_v22 }
  0x73   : > { %1373 = vmatmul.msk.f32.gmra.mxu0 %vm371_vm0, %v343_v25 }
  0x90   : > { %v437_v38 = vpop.f32.mrf.mxu0 }
  0x91   : > { %v438_v39 = vadd.f32 %v1670_v36, %v437_v38 }
  0x93   : > { %v489_v40 = vsub.f32 %v438_v39, %v1675_v37  ;;  %v521_v41 = vadd.f32 %v1675_v37, %v438_v39 }
  0x95   : > { %v505_v42 = vmax.f32 %v489_v40, 0.0  ;;  %v537_v43 = vmax.f32 %v521_v41, 0.0 }
  0x97   : > { %v553_v44 = vadd.f32 %v537_v43, %v505_v42  ;;  %v585_v45 = vsub.f32 %v537_v43, %v505_v42 }
  0x98   : > { %v440_v46 = vpop.f32.mrf.mxu0 }
  0x99   : > { %v441_v47 = vadd.f32 %v1670_v36, %v440_v46  ;;  %v569_v48 = vmul.f32 0.5, %v553_v44  ;;  %v601_v49 = vmul.f32 0.5, %v585_v45 }
  0x9b   : > { %v490_v50 = vsub.f32 %v441_v47, %v1675_v37  ;;  %v522_v51 = vadd.f32 %v1675_v37, %v441_v47  ;;  %1377 = vmatmul.msk.f32.vlgmr.msra.gmra.mxu1 %vm629_vm1, %v569_v48  ;;  %1393 = vmatmul.msk.f32.vlgmr.msra.gmra.mxu2 %vm629_vm1, %v601_v49 }
  0x9d   : > { %v506_v52 = vmax.f32 %v490_v50, 0.0  ;;  %v538_v53 = vmax.f32 %v522_v51, 0.0 }
  0x9f   : > { %v554_v54 = vadd.f32 %v538_v53, %v506_v52  ;;  %v586_v55 = vsub.f32 %v538_v53, %v506_v52 }
  0xa0   : > { %v443_v56 = vpop.f32.mrf.mxu0 }
  0xa1   : > { %v444_v57 = vadd.f32 %v1670_v36, %v443_v56  ;;  %v570_v58 = vmul.f32 0.5, %v554_v54  ;;  %v602_v59 = vmul.f32 0.5, %v586_v55 }
  0xa3   : > { %v491_v60 = vsub.f32 %v444_v57, %v1675_v37  ;;  %v523_v61 = vadd.f32 %v1675_v37, %v444_v57  ;;  %1378 = vmatmul.msk.f32.gmra.mxu1 %vm629_vm1, %v570_v58  ;;  %1394 = vmatmul.msk.f32.gmra.mxu2 %vm629_vm1, %v602_v59 }
  0xa5   : > { %v507_v62 = vmax.f32 %v491_v60, 0.0  ;;  %v539_v63 = vmax.f32 %v523_v61, 0.0 }
  0xa7   : > { %v587_v0 = vsub.f32 %v539_v63, %v507_v62  ;;  %v555_v1 = vadd.f32 %v539_v63, %v507_v62 }
  0xa8   : > { %v446_v2 = vpop.f32.mrf.mxu0 }
  0xa9   : > { %v447_v3 = vadd.f32 %v1670_v36, %v446_v2  ;;  %v603_v4 = vmul.f32 0.5, %v587_v0  ;;  %v571_v5 = vmul.f32 0.5, %v555_v1 }
  0xab   : > { %v492_v6 = vsub.f32 %v447_v3, %v1675_v37  ;;  %v524_v7 = vadd.f32 %v1675_v37, %v447_v3  ;;  %1395 = vmatmul.msk.f32.gmra.mxu2 %vm629_vm1, %v603_v4  ;;  %1379 = vmatmul.msk.f32.gmra.mxu1 %vm629_vm1, %v571_v5  ;;  %v1728_v4 = vld [vmem:[%s1724_s18 + $0x8] sm:$0xff] }
  0xac   : > { %vm897_vm4 = vcmp.gt.f32.partialorder %v1728_v4, 0.5 }
  0xad   : > { %v508_v8 = vmax.f32 %v492_v6, 0.0  ;;  %v540_v9 = vmax.f32 %v524_v7, 0.0  ;;  %v1124_v7 = vsel %vm928_vm2, %v1728_v4, 0.0 }
  0xae   : > { %1125 = vadd.xlane.f32.xlu0 %v1124_v7  ;;  %v1801_v7 = vld [vmem:[%s1724_s18 + $0x68] sm:$0xff] }
  0xaf   : > { %v588_v10 = vsub.f32 %v540_v9, %v508_v8  ;;  %v556_v11 = vadd.f32 %v540_v9, %v508_v8  ;;  %vm909_vm0 = vcmp.gt.f32.partialorder %v1801_v7, 0.5 }
  0xb0   : > { %v449_v12 = vpop.f32.mrf.mxu0 }
  0xb1   : > { %v450_v13 = vadd.f32 %v1670_v36, %v449_v12  ;;  %v604_v14 = vmul.f32 0.5, %v588_v10  ;;  %v572_v15 = vmul.f32 0.5, %v556_v11  ;;  %v1737_v10 = vld [vmem:[%s1724_s18 + $0x20] sm:$0xff] }
  0xb2   : > { %vm900_vm7 = vcmp.gt.f32.partialorder %v1737_v10, 0.5 }
  0xb3   : > { %v493_v16 = vsub.f32 %v450_v13, %v1675_v37  ;;  %v525_v17 = vadd.f32 %v1675_v37, %v450_v13  ;;  %1396 = vmatmul.msk.f32.gmra.mxu2 %vm629_vm1, %v604_v14  ;;  %1380 = vmatmul.msk.f32.gmra.mxu1 %vm629_vm1, %v572_v15 }
  0xb5   : > { %v509_v18 = vmax.f32 %v493_v16, 0.0  ;;  %v541_v19 = vmax.f32 %v525_v17, 0.0  ;;  %v1133_v17 = vsel %vm928_vm2, %v1737_v10, 0.0 }
  0xb6   : > { %1134 = vadd.xlane.f32.xlu0 %v1133_v17 }
  0xb7   : > { %v589_v20 = vsub.f32 %v541_v19, %v509_v18  ;;  %v557_v21 = vadd.f32 %v541_v19, %v509_v18 }
  0xb8   : > { %v452_v22 = vpop.f32.mrf.mxu0 }
  0xb9   : > { %v453_v23 = vadd.f32 %v1670_v36, %v452_v22  ;;  %v605_v24 = vmul.f32 0.5, %v589_v20  ;;  %v573_v25 = vmul.f32 0.5, %v557_v21  ;;  %v1747_v20 = vld [vmem:[%s1724_s18 + $0x10] sm:$0xff]  ;;  %v1750_v21 = vld [vmem:[%s1724_s18] sm:$0xff] }
  0xba   : > { %v1127_v22 = vsel %vm928_vm2, %v1747_v20, 0.0  ;;  %vm896_vm3 = vcmp.gt.f32.partialorder %v1750_v21, 0.5  ;;  %vm898_vm5 = vcmp.gt.f32.partialorder %v1747_v20, 0.5 }
  0xbb   : > { %v494_v26 = vsub.f32 %v453_v23, %v1675_v37  ;;  %v526_v27 = vadd.f32 %v1675_v37, %v453_v23  ;;  %1397 = vmatmul.msk.f32.gmra.mxu2 %vm629_vm1, %v605_v24  ;;  %1381 = vmatmul.msk.f32.gmra.mxu1 %vm629_vm1, %v573_v25  ;;  %v1121_v23 = vsel %vm928_vm2, %v1750_v21, 0.0 }
  0xbc   : > { %1128 = vadd.xlane.f32.xlu1 %v1127_v22  ;;  %1122 = vadd.xlane.f32.xlu2 %v1121_v23 }
  0xbd   : > { %v510_v28 = vmax.f32 %v494_v26, 0.0  ;;  %v542_v29 = vmax.f32 %v526_v27, 0.0  ;;  %v1757_v26 = vld [vmem:[%s1724_s18 + $0x38] sm:$0xff] }
  0xbe   : > { %vm903_vm10 = vcmp.gt.f32.partialorder %v1757_v26, 0.5 }
  0xbf   : > { %v590_v30 = vsub.f32 %v542_v29, %v510_v28  ;;  %v558_v31 = vadd.f32 %v542_v29, %v510_v28 }
  0xc0   : > { %v455_v32 = vpop.f32.mrf.mxu0 }
  0xc1   : > { %v456_v33 = vadd.f32 %v1670_v36, %v455_v32  ;;  %v606_v34 = vmul.f32 0.5, %v590_v30  ;;  %v574_v35 = vmul.f32 0.5, %v558_v31  ;;  %v476_v30 = vpop.f32.mrf.mxu3 }
  0xc3   : > { %v495_v38 = vsub.f32 %v456_v33, %v1675_v37  ;;  %v527_v39 = vadd.f32 %v1675_v37, %v456_v33  ;;  %1398 = vmatmul.msk.f32.gmra.mxu2 %vm629_vm1, %v606_v34  ;;  %1382 = vmatmul.msk.f32.gmra.mxu1 %vm629_vm1, %v574_v35  ;;  %v1142_v34 = vsel %vm928_vm2, %v1757_v26, 0.0 }
  0xc4   : > { %1143 = vadd.xlane.f32.xlu0 %v1142_v34 }
  0xc5   : > { %v511_v40 = vmax.f32 %v495_v38, 0.0  ;;  %v543_v41 = vmax.f32 %v527_v39, 0.0  ;;  %v1767_v39 = vld [vmem:[%s1724_s18 + $0x28] sm:$0xff] }
  0xc6   : > { %vm901_vm8 = vcmp.gt.f32.partialorder %v1767_v39, 0.5 }
  0xc7   : > { %v591_v42 = vsub.f32 %v543_v41, %v511_v40  ;;  %v559_v43 = vadd.f32 %v543_v41, %v511_v40  ;;  %v1770_v40 = vld [vmem:[%s1724_s18 + $0x18] sm:$0xff]  ;;  %v1136_v41 = vsel %vm928_vm2, %v1767_v39, 0.0 }
  0xc8   : > { %v458_v44 = vpop.f32.mrf.mxu0  ;;  %1137 = vadd.xlane.f32.xlu1 %v1136_v41  ;;  %vm899_vm6 = vcmp.gt.f32.partialorder %v1770_v40, 0.5 }
  0xc9   : > { %v459_v45 = vadd.f32 %v1670_v36, %v458_v44  ;;  %v607_v46 = vmul.f32 0.5, %v591_v42  ;;  %v575_v47 = vmul.f32 0.5, %v559_v43  ;;  %v1130_v42 = vsel %vm928_vm2, %v1770_v40, 0.0 }
  0xca   : > { %1131 = vadd.xlane.f32.xlu2 %v1130_v42 }
  0xcb   : > { %v496_v48 = vsub.f32 %v459_v45, %v1675_v37  ;;  %v528_v49 = vadd.f32 %v1675_v37, %v459_v45  ;;  %1399 = vmatmul.msk.f32.gmra.mxu2 %vm629_vm1, %v607_v46  ;;  %1383 = vmatmul.msk.f32.gmra.mxu1 %vm629_vm1, %v575_v47  ;;  %v477_v45 = vadd.f32 %v1670_v36, %v476_v30  ;;  %v1778_v46 = vld [vmem:[%s1724_s18 + $0x50] sm:$0xff] }
  0xcc   : > { %vm906_vm13 = vcmp.gt.f32.partialorder %v1778_v46, 0.5 }
  0xcd   : > { %v512_v50 = vmax.f32 %v496_v48, 0.0  ;;  %v544_v51 = vmax.f32 %v528_v49, 0.0 }
  0xcf   : > { %v592_v52 = vsub.f32 %v544_v51, %v512_v50  ;;  %v560_v53 = vadd.f32 %v544_v51, %v512_v50 }
  0xd0   : > { %v461_v54 = vpop.f32.mrf.mxu0 }
  0xd1   : > { %v462_v55 = vadd.f32 %v1670_v36, %v461_v54  ;;  %v608_v56 = vmul.f32 0.5, %v592_v52  ;;  %v576_v57 = vmul.f32 0.5, %v560_v53  ;;  %v1151_v53 = vsel %vm928_vm2, %v1778_v46, 0.0 }
  0xd2   : > { %v502_v54 = vsub.f32 %v477_v45, %v1675_v37  ;;  %1152 = vadd.xlane.f32.xlu0 %v1151_v53 }
  0xd3   : > { %v497_v58 = vsub.f32 %v462_v55, %v1675_v37  ;;  %v529_v59 = vadd.f32 %v1675_v37, %v462_v55  ;;  %1400 = vmatmul.msk.f32.gmra.mxu2 %vm629_vm1, %v608_v56  ;;  %1384 = vmatmul.msk.f32.gmra.mxu1 %vm629_vm1, %v576_v57  ;;  %v479_v55 = vpop.f32.mrf.mxu3 }
  0xd5   : > { %v513_v60 = vmax.f32 %v497_v58, 0.0  ;;  %v545_v61 = vmax.f32 %v529_v59, 0.0  ;;  %v534_v58 = vadd.f32 %v1675_v37, %v477_v45  ;;  %v1790_v59 = vld [vmem:[%s1724_s18 + $0x40] sm:$0xff] }
  0xd6   : > { %vm904_vm11 = vcmp.gt.f32.partialorder %v1790_v59, 0.5 }
  0xd7   : > { %v593_v62 = vsub.f32 %v545_v61, %v513_v60  ;;  %v561_v63 = vadd.f32 %v545_v61, %v513_v60  ;;  %v1793_v60 = vld [vmem:[%s1724_s18 + $0x30] sm:$0xff]  ;;  %v1145_v61 = vsel %vm928_vm2, %v1790_v59, 0.0 }
  0xd8   : > { %v464_v0 = vpop.f32.mrf.mxu0  ;;  %1146 = vadd.xlane.f32.xlu1 %v1145_v61  ;;  %vm902_vm9 = vcmp.gt.f32.partialorder %v1793_v60, 0.5 }
  0xd9   : > { %v465_v1 = vadd.f32 %v1670_v36, %v464_v0  ;;  %v609_v2 = vmul.f32 0.5, %v593_v62  ;;  %v577_v3 = vmul.f32 0.5, %v561_v63  ;;  %v1139_v62 = vsel %vm928_vm2, %v1793_v60, 0.0 }
  0xda   : > { %1140 = vadd.xlane.f32.xlu2 %v1139_v62 }
  0xdb   : > { %v498_v5 = vsub.f32 %v465_v1, %v1675_v37  ;;  %v530_v6 = vadd.f32 %v1675_v37, %v465_v1  ;;  %1401 = vmatmul.msk.f32.gmra.mxu2 %vm629_vm1, %v609_v2  ;;  %1385 = vmatmul.msk.f32.gmra.mxu1 %vm629_vm1, %v577_v3  ;;  %v518_v2 = vmax.f32 %v502_v54, 0.0  ;;  %v550_v3 = vmax.f32 %v534_v58, 0.0 }
  0xdd   : > { %v514_v8 = vmax.f32 %v498_v5, 0.0  ;;  %v546_v9 = vmax.f32 %v530_v6, 0.0  ;;  %v480_v5 = vadd.f32 %v1670_v36, %v479_v55 }
  0xdf   : > { %v594_v11 = vsub.f32 %v546_v9, %v514_v8  ;;  %v562_v12 = vadd.f32 %v546_v9, %v514_v8  ;;  %v1160_v8 = vsel %vm928_vm2, %v1801_v7, 0.0  ;;  %v503_v9 = vsub.f32 %v480_v5, %v1675_v37 }
  0xe0   : > { %v467_v13 = vpop.f32.mrf.mxu0  ;;  %1161 = vadd.xlane.f32.xlu0 %v1160_v8 }
  0xe1   : > { %v468_v14 = vadd.f32 %v1670_v36, %v467_v13  ;;  %v610_v15 = vmul.f32 0.5, %v594_v11  ;;  %v578_v16 = vmul.f32 0.5, %v562_v12  ;;  %v535_v11 = vadd.f32 %v1675_v37, %v480_v5  ;;  %v1809_v13 = vld [vmem:[%s1724_s18 + $0x58] sm:$0xff] }
  0xe2   : > { %v566_v12 = vadd.f32 %v550_v3, %v518_v2  ;;  %vm907_vm14 = vcmp.gt.f32.partialorder %v1809_v13, 0.5 }
  0xe3   : > { %v499_v18 = vsub.f32 %v468_v14, %v1675_v37  ;;  %v531_v19 = vadd.f32 %v1675_v37, %v468_v14  ;;  %1402 = vmatmul.msk.f32.gmra.mxu2 %vm629_vm1, %v610_v15  ;;  %1386 = vmatmul.msk.f32.gmra.mxu1 %vm629_vm1, %v578_v16  ;;  %v1812_v14 = vld [vmem:[%s1724_s18 + $0x48] sm:$0xff]  ;;  %v482_v15 = vpop.f32.mrf.mxu3  ;;  %v1154_v16 = vsel %vm928_vm2, %v1809_v13, 0.0 }
  0xe4   : > { %v1148_v17 = vsel %vm928_vm2, %v1812_v14, 0.0  ;;  %1155 = vadd.xlane.f32.xlu1 %v1154_v16  ;;  %v582_v22 = vmul.f32 0.5, %v566_v12  ;;  %v483_v23 = vadd.f32 %v1670_v36, %v482_v15  ;;  %vm905_vm12 = vcmp.gt.f32.partialorder %v1812_v14, 0.5 }
  0xe5   : > { %v515_v24 = vmax.f32 %v499_v18, 0.0  ;;  %v547_v25 = vmax.f32 %v531_v19, 0.0  ;;  %1149 = vadd.xlane.f32.xlu2 %v1148_v17  ;;  %v519_v18 = vmax.f32 %v503_v9, 0.0  ;;  %v551_v19 = vmax.f32 %v535_v11, 0.0 }
  0xe7   : > { %v595_v27 = vsub.f32 %v547_v25, %v515_v24  ;;  %v563_v28 = vadd.f32 %v547_v25, %v515_v24  ;;  %v504_v24 = vsub.f32 %v483_v23, %v1675_v37  ;;  %v536_v25 = vadd.f32 %v1675_v37, %v483_v23 }
  0xe8   : > { %v470_v29 = vpop.f32.mrf.mxu0 }
  0xe9   : > { %v471_v31 = vadd.f32 %v1670_v36, %v470_v29  ;;  %v611_v32 = vmul.f32 0.5, %v595_v27  ;;  %v579_v33 = vmul.f32 0.5, %v563_v28  ;;  %v567_v27 = vadd.f32 %v551_v19, %v519_v18  ;;  %v1823_v28 = vld [vmem:[%s1724_s18 + $0x70] sm:$0xff]  ;;  %v1826_v29 = vld [vmem:[%s1724_s18 + $0x60] sm:$0xff] }
  0xea   : > { %v1163_v30 = vsel %vm928_vm2, %v1823_v28, 0.0  ;;  %vm908_vm15 = vcmp.gt.f32.partialorder %v1826_v29, 0.5 }
  0xeb   : > { %v500_v35 = vsub.f32 %v471_v31, %v1675_v37  ;;  %v532_v38 = vadd.f32 %v1675_v37, %v471_v31  ;;  %1403 = vmatmul.msk.f32.gmra.mxu2 %vm629_vm1, %v611_v32  ;;  %1387 = vmatmul.msk.f32.gmra.mxu1 %vm629_vm1, %v579_v33  ;;  %v1157_v31 = vsel %vm928_vm2, %v1826_v29, 0.0  ;;  %v552_v32 = vmax.f32 %v536_v25, 0.0 }
  0xec   : > { %1164 = vadd.xlane.f32.xlu1 %v1163_v30  ;;  %v583_v33 = vmul.f32 0.5, %v567_v27 }
  0xed   : > { %v516_v43 = vmax.f32 %v500_v35, 0.0  ;;  %v548_v44 = vmax.f32 %v532_v38, 0.0  ;;  %1158 = vadd.xlane.f32.xlu2 %v1157_v31 }
  0xef   : > { %v596_v47 = vsub.f32 %v548_v44, %v516_v43  ;;  %v564_v48 = vadd.f32 %v548_v44, %v516_v43  ;;  %v1842_v44 = vld [vmem:[%s2201_s6] ss:$0 sm:$0xff] }
  0xf0   : > { %v473_v49 = vpop.f32.mrf.mxu0 }
  0xf1   : > { %v474_v50 = vadd.f32 %v1670_v36, %v473_v49  ;;  %v612_v51 = vmul.f32 0.5, %v596_v47  ;;  %v580_v52 = vmul.f32 0.5, %v564_v48  ;;  %v520_v36 = vmax.f32 %v504_v24, 0.0 }
  0xf2   : > { %v598_v47 = vsub.f32 %v550_v3, %v518_v2 }
  0xf3   : > { %v501_v56 = vsub.f32 %v474_v50, %v1675_v37  ;;  %v533_v57 = vadd.f32 %v1675_v37, %v474_v50  ;;  %1404 = vmatmul.msk.f32.gmra.mxu2 %vm629_vm1, %v612_v51  ;;  %1388 = vmatmul.msk.f32.gmra.mxu1 %vm629_vm1, %v580_v52  ;;  %v568_v34 = vadd.f32 %v552_v32, %v520_v36  ;;  %v1834_v37 = vld [vmem:[%s1724_s18 + $0x78] sm:$0xff] }
  0xf4   : > { %v1166_v35 = vsel %vm928_vm2, %v1834_v37, 0.0  ;;  %v614_v52 = vmul.f32 0.5, %v598_v47 }
  0xf5   : > { %v517_v63 = vmax.f32 %v501_v56, 0.0  ;;  %v549_v0 = vmax.f32 %v533_v57, 0.0  ;;  %1167 = vadd.xlane.f32.xlu2 %v1166_v35  ;;  %v584_v38 = vmul.f32 0.5, %v568_v34  ;;  %v599_v56 = vsub.f32 %v551_v19, %v519_v18 }
  0xf7   : > { %v565_v1 = vadd.f32 %v549_v0, %v517_v63  ;;  %v597_v41 = vsub.f32 %v549_v0, %v517_v63  ;;  %v615_v0 = vmul.f32 0.5, %v599_v56 }
  0xf9   : > { %v581_v6 = vmul.f32 0.5, %v565_v1  ;;  %v613_v43 = vmul.f32 0.5, %v597_v41 }
  0xfb   : > { %1389 = vmatmul.msk.f32.vlgmr.msrb.gmra.mxu3 %vm629_vm1, %v581_v6 }
 0x103   : > { %1390 = vmatmul.msk.f32.gmra.mxu3 %vm629_vm1, %v582_v22 }
 0x10b   : > { %1391 = vmatmul.msk.f32.gmra.mxu3 %vm629_vm1, %v583_v33 }
 0x113   : > { %1392 = vmatmul.msk.f32.gmra.mxu3 %vm629_vm1, %v584_v38 }
 0x118   : > { %v695_v42 = vpop.f32.mrf.mxu1 }
 0x119   : > { %v696_v45 = vadd.f32 %v1842_v44, %v695_v42 }
 0x11b   : > { %1405 = vmatmul.msk.f32.vlgmr.msra.gmra.mxu3 %vm629_vm1, %v613_v43 }
 0x11e   : > { %v816_v48 = vpop.f32.mrf.mxu2 }
 0x11f   : > { %v864_v49 = vsub.f32 %v696_v45, %v816_v48  ;;  %v880_v50 = vadd.f32 %v816_v48, %v696_v45 }
 0x120   : > { %v698_v51 = vpop.f32.mrf.mxu1 }
 0x121   : > { %v1847_v53 = vsel %vm896_vm3, %v864_v49, %v880_v50  ;;  %v699_v55 = vadd.f32 %v1842_v44, %v698_v51  ;;  %vm911_vm3 = vcmp.gt.f32.partialorder %v1834_v37, 0.5 }
 0x122   : > { %v929_v54 = vsel %vm928_vm2, %v1847_v53, -inf  ;;  %v1169_v58 = vmul.f32 %v1847_v53, %v1750_v21  ;;  %v600_v21 = vsub.f32 %v552_v32, %v520_v36 }
 0x123   : > { %1406 = vmatmul.msk.f32.gmra.mxu3 %vm629_vm1, %v614_v52  ;;  %930 = vmax.xlane.f32.xlu0 %v929_v54 }
 0x124   : > { %v1185_v2 = vsel %vm928_vm2, %v1169_v58, 0.0  ;;  %v616_v15 = vmul.f32 0.5, %v600_v21 }
 0x126   : > { %v819_v57 = vpop.f32.mrf.mxu2 }
 0x127   : > { %v865_v61 = vsub.f32 %v699_v55, %v819_v57  ;;  %v881_v62 = vadd.f32 %v819_v57, %v699_v55 }
 0x128   : > { %v701_v63 = vpop.f32.mrf.mxu1 }
 0x129   : > { %v1856_v1 = vsel %vm897_vm4, %v865_v61, %v881_v62  ;;  %v702_v6 = vadd.f32 %v1842_v44, %v701_v63  ;;  %vm1265_vm4 = vcmask 7168  }
 0x12a   : > { %v1170_v3 = vmul.f32 %v1856_v1, %v1728_v4  ;;  %v932_v4 = vsel %vm928_vm2, %v1856_v1, -inf }
 0x12b   : > { %1407 = vmatmul.msk.f32.gmra.mxu3 %vm629_vm1, %v615_v0  ;;  %1186 = vadd.xlane.f32.xlu0 %v1185_v2 }
 0x12c   : > { %v1188_v5 = vsel %vm928_vm2, %v1170_v3, 0.0 }
 0x12d   : > { %1189 = vadd.xlane.f32.xlu1 %v1188_v5 }
 0x12e   : > { %v822_v8 = vpop.f32.mrf.mxu2 }
 0x12f   : > { %v866_v9 = vsub.f32 %v702_v6, %v822_v8  ;;  %v882_v11 = vadd.f32 %v822_v8, %v702_v6 }
 0x130   : > { %v704_v12 = vpop.f32.mrf.mxu1 }
 0x131   : > { %v1865_v16 = vsel %vm898_vm5, %v866_v9, %v882_v11  ;;  %v705_v22 = vadd.f32 %v1842_v44, %v704_v12 }
 0x132   : > { %v1171_v17 = vmul.f32 %v1865_v16, %v1747_v20  ;;  %v935_v19 = vsel %vm928_vm2, %v1865_v16, -inf }
 0x133   : > { %1408 = vmatmul.msk.f32.gmra.mxu3 %vm629_vm1, %v616_v15  ;;  %933 = vmax.xlane.f32.xlu0 %v932_v4  ;;  %vm910_vm1 = vcmp.gt.f32.partialorder %v1823_v28, 0.5 }
 0x134   : > { %v1191_v18 = vsel %vm928_vm2, %v1171_v17, 0.0  ;;  %v1917_v17 = vpop.xlane.xlu0 %1125 }
 0x135   : > { %1192 = vadd.xlane.f32.xlu2 %v1191_v18  ;;  %936 = vmax.xlane.f32.xlu1 %v935_v19 }
 0x136   : > { %v825_v23 = vpop.f32.mrf.mxu2 }
 0x137   : > { %v867_v24 = vsub.f32 %v705_v22, %v825_v23  ;;  %v883_v25 = vadd.f32 %v825_v23, %v705_v22 }
 0x138   : > { %v707_v27 = vpop.f32.mrf.mxu1 }
 0x139   : > { %v1877_v30 = vsel %vm899_vm6, %v867_v24, %v883_v25  ;;  %v708_v32 = vadd.f32 %v1842_v44, %v707_v27 }
 0x13a   : > { %v1172_v20 = vmul.f32 %v1877_v30, %v1770_v40  ;;  %v938_v31 = vsel %vm928_vm2, %v1877_v30, -inf }
 0x13c   : > { %v1194_v36 = vsel %vm928_vm2, %v1172_v20, 0.0 }
 0x13d   : > { %939 = vmax.xlane.f32.xlu1 %v938_v31  ;;  %1195 = vadd.xlane.f32.xlu0 %v1194_v36  ;;  %v1926_v31 = vpop.xlane.xlu1 %1128 }
 0x13e   : > { %v828_v33 = vpop.f32.mrf.mxu2 }
 0x13f   : > { %v868_v34 = vsub.f32 %v708_v32, %v828_v33  ;;  %v884_v35 = vadd.f32 %v828_v33, %v708_v32  ;;  %v1929_v32 = vpop.xlane.xlu0 %1134 }
 0x140   : > { %v710_v38 = vpop.f32.mrf.mxu1 }
 0x141   : > { %v1886_v41 = vsel %vm900_vm7, %v868_v34, %v884_v35  ;;  %v711_v45 = vadd.f32 %v1842_v44, %v710_v38 }
 0x142   : > { %v941_v40 = vsel %vm928_vm2, %v1886_v41, -inf  ;;  %v1173_v42 = vmul.f32 %v1886_v41, %v1737_v10 }
 0x143   : > { %942 = vmax.xlane.f32.xlu2 %v941_v40 }
 0x144   : > { %v1197_v43 = vsel %vm928_vm2, %v1173_v42, 0.0  ;;  %v1935_v42 = vpop.xlane.xlu2 %1122 }
 0x145   : > { %1198 = vadd.xlane.f32.xlu1 %v1197_v43 }
 0x146   : > { %v831_v47 = vpop.f32.mrf.mxu2 }
 0x147   : > { %v869_v48 = vsub.f32 %v711_v45, %v831_v47  ;;  %v885_v49 = vadd.f32 %v831_v47, %v711_v45 }
 0x148   : > { %v713_v50 = vpop.f32.mrf.mxu1 }
 0x149   : > { %v1895_v51 = vsel %vm901_vm8, %v869_v48, %v885_v49  ;;  %v714_v10 = vadd.f32 %v1842_v44, %v713_v50  ;;  %v1939_v49 = vpop.xlane.xlu1 %1137  ;;  %v1941_v50 = vpop.xlane.xlu0 %1143 }
 0x14a   : > { %v944_v52 = vsel %vm928_vm2, %v1895_v51, -inf }
 0x14b   : > { %945 = vmax.xlane.f32.xlu2 %v944_v52 }
 0x14e   : > { %v834_v54 = vpop.f32.mrf.mxu2 }
 0x14f   : > { %v870_v55 = vsub.f32 %v714_v10, %v834_v54  ;;  %v886_v56 = vadd.f32 %v834_v54, %v714_v10  ;;  %v1947_v54 = vpop.xlane.xlu2 %1131 }
 0x150   : > { %v716_v57 = vpop.f32.mrf.mxu1 }
 0x151   : > { %v1901_v58 = vsel %vm902_vm9, %v870_v55, %v886_v56  ;;  %v717_v62 = vadd.f32 %v1842_v44, %v716_v57  ;;  %v1949_v56 = vpop.xlane.xlu1 %1146  ;;  %v1951_v57 = vpop.xlane.xlu0 %1152 }
 0x152   : > { %v947_v61 = vsel %vm928_vm2, %v1901_v58, -inf }
 0x153   : > { %948 = vmax.xlane.f32.xlu0 %v947_v61 }
 0x156   : > { %v837_v63 = vpop.f32.mrf.mxu2 }
 0x157   : > { %v871_v0 = vsub.f32 %v717_v62, %v837_v63  ;;  %v887_v2 = vadd.f32 %v837_v63, %v717_v62  ;;  %v1953_v62 = vpop.xlane.xlu2 %1140 }
 0x158   : > { %v719_v3 = vpop.f32.mrf.mxu1 }
 0x159   : > { %v1907_v5 = vsel %vm903_vm10, %v871_v0, %v887_v2  ;;  %v720_v21 = vadd.f32 %v1842_v44, %v719_v3  ;;  %v1955_v63 = vpop.xlane.xlu1 %1155  ;;  %v1957_v0 = vpop.xlane.xlu0 %1161 }
 0x15a   : > { %v950_v6 = vsel %vm928_vm2, %v1907_v5, -inf }
 0x15b   : > { %951 = vmax.xlane.f32.xlu1 %v950_v6 }
 0x15e   : > { %v840_v8 = vpop.f32.mrf.mxu2 }
 0x15f   : > { %v872_v9 = vsub.f32 %v720_v21, %v840_v8  ;;  %v888_v11 = vadd.f32 %v840_v8, %v720_v21  ;;  %v1959_v3 = vpop.xlane.xlu2 %1149 }
 0x160   : > { %v722_v12 = vpop.f32.mrf.mxu1 }
 0x161   : > { %v1913_v15 = vsel %vm904_vm11, %v872_v9, %v888_v11  ;;  %v723_v18 = vadd.f32 %v1842_v44, %v722_v12  ;;  %v1961_v6 = vpop.xlane.xlu1 %1164 }
 0x162   : > { %v953_v4 = vsel %vm928_vm2, %v1913_v15, -inf }
 0x163   : > { %954 = vmax.xlane.f32.xlu2 %v953_v4 }
 0x166   : > { %v843_v19 = vpop.f32.mrf.mxu2 }
 0x167   : > { %v873_v22 = vsub.f32 %v723_v18, %v843_v19  ;;  %v889_v23 = vadd.f32 %v843_v19, %v723_v18  ;;  %v1967_v12 = vpop.xlane.xlu2 %1158 }
 0x168   : > { %v725_v24 = vpop.f32.mrf.mxu1 }
 0x169   : > { %v1921_v25 = vsel %vm905_vm12, %v873_v22, %v889_v23  ;;  %v726_v20 = vadd.f32 %v1842_v44, %v725_v24 }
 0x16a   : > { %v956_v27 = vsel %vm928_vm2, %v1921_v25, -inf }
 0x16b   : > { %957 = vmax.xlane.f32.xlu0 %v956_v27 }
 0x16e   : > { %v846_v36 = vpop.f32.mrf.mxu2 }
 0x16f   : > { %v874_v33 = vsub.f32 %v726_v20, %v846_v36  ;;  %v890_v34 = vadd.f32 %v846_v36, %v726_v20 }
 0x170   : > { %v728_v38 = vpop.f32.mrf.mxu1 }
 0x171   : > { %v1931_v35 = vsel %vm906_vm13, %v874_v33, %v890_v34  ;;  %v729_v43 = vadd.f32 %v1842_v44, %v728_v38  ;;  %v1980_v33 = vpop.xlane.xlu2 %1167 }
 0x172   : > { %v959_v40 = vsel %vm928_vm2, %v1931_v35, -inf }
 0x173   : > { %960 = vmax.xlane.f32.xlu1 %v959_v40 }
 0x176   : > { %v849_v45 = vpop.f32.mrf.mxu2 }
 0x177   : > { %v875_v47 = vsub.f32 %v729_v43, %v849_v45  ;;  %v891_v48 = vadd.f32 %v849_v45, %v729_v43 }
 0x179   : > { %v1943_v52 = vsel %vm907_vm14, %v875_v47, %v891_v48 }
 0x17a   : > { %v962_v10 = vsel %vm928_vm2, %v1943_v52, -inf }
 0x17b   : > { %963 = vmax.xlane.f32.xlu2 %v962_v10 }
 0x17e   : > { %v731_v55 = vpop.f32.mrf.mxu3 }
 0x17f   : > { %v732_v4 = vadd.f32 %v1842_v44, %v731_v55 }
 0x186   : > { %v734_v61 = vpop.f32.mrf.mxu3 }
 0x187   : > { %v735_v34 = vadd.f32 %v1842_v44, %v734_v61 }
 0x18e   : > { %v737_v2 = vpop.f32.mrf.mxu3 }
 0x196   : > { %v740_v21 = vpop.f32.mrf.mxu3  ;;  %v1963_v8 = vpop.xlane.xlu0 %930 }
 0x197   : > { %v977_v9 = vsub.f32 %v1847_v53, %v1963_v8 }
 0x199   : > { %v993_v11 = vmul.f32 1.442695, %v977_v9 }
 0x19b   : > { %1442 = vpow2.f32 %v993_v11 }
 0x19e   : > { %v852_v18 = vpop.f32.mrf.mxu3  ;;  %v1970_v19 = vpop.xlane.xlu0 %1186 }
 0x19f   : > { %v876_v22 = vsub.f32 %v732_v4, %v852_v18  ;;  %v892_v23 = vadd.f32 %v852_v18, %v732_v4 }
 0x1a0   : > { %v1973_v24 = vpop.xlane.xlu1 %1189 }
 0x1a1   : > { %v1443_v27 = vpop.eup %1442  ;;  %v1975_v20 = vsel %vm908_vm15, %v876_v22, %v892_v23 }
 0x1a2   : > { %v965_v53 = vsel %vm928_vm2, %v1975_v20, -inf  ;;  %v1025_v36 = vsel %vm928_vm2, %v1443_v27, 0.0 }
 0x1a3   : > { %966 = vmax.xlane.f32.xlu0 %v965_v53  ;;  %1026 = vadd.xlane.f32.xlu1 %v1025_v36 }
 0x1a6   : > { %v855_v38 = vpop.f32.mrf.mxu3  ;;  %v1983_v40 = vpop.xlane.xlu0 %933 }
 0x1a7   : > { %v877_v43 = vsub.f32 %v735_v34, %v855_v38  ;;  %v893_v45 = vadd.f32 %v855_v38, %v735_v34  ;;  %v978_v47 = vsub.f32 %v1856_v1, %v1983_v40  ;;  %v1176_v1 = vmul.f32 %v1907_v5, %v1757_v26 }
 0x1a8   : > { %v1988_v48 = vpop.xlane.xlu1 %936  ;;  %v1996_v4 = vpop.xlane.xlu2 %1192 }
 0x1a9   : > { %v995_v10 = vmul.f32 1.442695, %v978_v47  ;;  %v979_v55 = vsub.f32 %v1865_v16, %v1988_v48  ;;  %v1992_v9 = vsel %vm909_vm0, %v877_v43, %v893_v45  ;;  %v738_v16 = vadd.f32 %v1842_v44, %v737_v2 }
 0x1aa   : > { %v968_v61 = vsel %vm928_vm2, %v1992_v9, -inf  ;;  %v1206_v53 = vsel %vm928_vm2, %v1176_v1, 0.0  ;;  %v741_v47 = vadd.f32 %v1842_v44, %v740_v21 }
 0x1ab   : > { %1444 = vpow2.f32 %v995_v10  ;;  %v997_v11 = vmul.f32 1.442695, %v979_v55  ;;  %969 = vmax.xlane.f32.xlu1 %v968_v61 }
 0x1ad   : > { %1446 = vpow2.f32 %v997_v11 }
 0x1ae   : > { %v858_v18 = vpop.f32.mrf.mxu3 }
 0x1af   : > { %v878_v38 = vsub.f32 %v738_v16, %v858_v18  ;;  %v894_v43 = vadd.f32 %v858_v18, %v738_v16  ;;  %v1174_v16 = vmul.f32 %v1895_v51, %v1767_v39 }
 0x1b0   : > { %v2000_v22 = vpop.xlane.xlu1 %939 }
 0x1b1   : > { %v1445_v23 = vpop.eup %1444  ;;  %v980_v27 = vsub.f32 %v1877_v30, %v2000_v22  ;;  %v2013_v61 = vsel %vm910_vm1, %v878_v38, %v894_v43  ;;  %v1200_v38 = vsel %vm928_vm2, %v1174_v16, 0.0 }
 0x1b2   : > { %v1028_v36 = vsel %vm928_vm2, %v1445_v23, 0.0  ;;  %v971_v18 = vsel %vm928_vm2, %v2013_v61, -inf  ;;  %v2022_v23 = vpop.xlane.xlu0 %1195 }
 0x1b3   : > { %v1447_v34 = vpop.eup %1446  ;;  %v999_v45 = vmul.f32 1.442695, %v980_v27  ;;  %1207 = vadd.xlane.f32.xlu1 %v1206_v53  ;;  %1029 = vadd.xlane.f32.xlu2 %v1028_v36  ;;  %v1175_v53 = vmul.f32 %v1901_v58, %v1793_v60  ;;  %v1177_v60 = vmul.f32 %v1913_v15, %v1790_v59 }
 0x1b4   : > { %v1031_v26 = vsel %vm928_vm2, %v1447_v34, 0.0 }
 0x1b5   : > { %1448 = vpow2.f32 %v999_v45  ;;  %1032 = vadd.xlane.f32.xlu0 %v1031_v26  ;;  %v1203_v43 = vsel %vm928_vm2, %v1175_v53, 0.0 }
 0x1b6   : > { %v861_v2 = vpop.f32.mrf.mxu3  ;;  %v2010_v30 = vpop.xlane.xlu2 %942 }
 0x1b7   : > { %v879_v10 = vsub.f32 %v741_v47, %v861_v2  ;;  %v895_v55 = vadd.f32 %v861_v2, %v741_v47  ;;  %v981_v36 = vsub.f32 %v1886_v41, %v2010_v30 }
 0x1b8   : > { %v2036_v26 = vpop.xlane.xlu1 %1198 }
 0x1b9   : > { %v2015_v11 = vsel %vm911_vm3, %v879_v10, %v895_v55  ;;  %v1001_v45 = vmul.f32 1.442695, %v981_v36  ;;  %v1209_v10 = vsel %vm928_vm2, %v1177_v60, 0.0 }
 0x1ba   : > { %v974_v44 = vsel %vm928_vm2, %v2015_v11, -inf }
 0x1bb   : > { %v1449_v1 = vpop.eup %1448  ;;  %972 = vmax.xlane.f32.xlu2 %v971_v18  ;;  %1450 = vpow2.f32 %v1001_v45 }
 0x1bc   : > { %v1034_v21 = vsel %vm928_vm2, %v1449_v1, 0.0 }
 0x1bd   : > { %975 = vmax.xlane.f32.xlu0 %v974_v44  ;;  %1035 = vadd.xlane.f32.xlu1 %v1034_v21 }
 0x1be   : > { %v2026_v27 = vpop.xlane.xlu2 %945 }
 0x1bf   : > { %v982_v34 = vsub.f32 %v1895_v51, %v2026_v27  ;;  %v1178_v51 = vmul.f32 %v1921_v25, %v1812_v14 }
 0x1c1   : > { %v1003_v39 = vmul.f32 1.442695, %v982_v34  ;;  %v1212_v55 = vsel %vm928_vm2, %v1178_v51, 0.0  ;;  %v1451_v1 = vpop.eup %1450 }
 0x1c2   : > { %v1037_v14 = vsel %vm928_vm2, %v1451_v1, 0.0 }
 0x1c3   : > { %1201 = vadd.xlane.f32.xlu2 %v1200_v38  ;;  %1452 = vpow2.f32 %v1003_v39 }
 0x1c5   : > { %1204 = vadd.xlane.f32.xlu0 %v1203_v43 }
 0x1c6   : > { %v2038_v47 = vpop.xlane.xlu0 %948 }
 0x1c7   : > { %v983_v41 = vsub.f32 %v1901_v58, %v2038_v47 }
 0x1c9   : > { %v1005_v2 = vmul.f32 1.442695, %v983_v41  ;;  %v1453_v58 = vpop.eup %1452 }
 0x1ca   : > { %v1040_v53 = vsel %vm928_vm2, %v1453_v58, 0.0 }
 0x1cb   : > { %1454 = vpow2.f32 %v1005_v2  ;;  %1210 = vadd.xlane.f32.xlu2 %v1209_v10 }
 0x1cd   : > { %1213 = vadd.xlane.f32.xlu0 %v1212_v55 }
 0x1ce   : > { %v2048_v18 = vpop.xlane.xlu1 %951 }
 0x1cf   : > { %v984_v59 = vsub.f32 %v1907_v5, %v2048_v18 }
 0x1d1   : > { %v1455_v44 = vpop.eup %1454  ;;  %v1007_v21 = vmul.f32 1.442695, %v984_v59 }
 0x1d2   : > { %v1043_v16 = vsel %vm928_vm2, %v1455_v44, 0.0 }
 0x1d3   : > { %1456 = vpow2.f32 %v1007_v21  ;;  %1038 = vadd.xlane.f32.xlu2 %v1037_v14  ;;  %1044 = vadd.xlane.f32.xlu1 %v1043_v16 }
 0x1d5   : > { %1041 = vadd.xlane.f32.xlu0 %v1040_v53 }
 0x1d6   : > { %v2055_v36 = vpop.xlane.xlu2 %954 }
 0x1d7   : > { %v985_v34 = vsub.f32 %v1913_v15, %v2055_v36 }
 0x1d9   : > { %v1457_v38 = vpop.eup %1456  ;;  %v1009_v5 = vmul.f32 1.442695, %v985_v34 }
 0x1da   : > { %v1046_v43 = vsel %vm928_vm2, %v1457_v38, 0.0 }
 0x1db   : > { %1458 = vpow2.f32 %v1009_v5  ;;  %1047 = vadd.xlane.f32.xlu2 %v1046_v43 }
 0x1de   : > { %v2060_v45 = vpop.xlane.xlu0 %957 }
 0x1df   : > { %v986_v39 = vsub.f32 %v1921_v25, %v2060_v45 }
 0x1e1   : > { %v1459_v60 = vpop.eup %1458  ;;  %v1011_v41 = vmul.f32 1.442695, %v986_v39 }
 0x1e2   : > { %v1049_v51 = vsel %vm928_vm2, %v1459_v60, 0.0 }
 0x1e3   : > { %1460 = vpow2.f32 %v1011_v41  ;;  %1050 = vadd.xlane.f32.xlu0 %v1049_v51 }
 0x1e6   : > { %v2065_v2 = vpop.xlane.xlu1 %960 }
 0x1e7   : > { %v987_v15 = vsub.f32 %v1931_v35, %v2065_v2 }
 0x1e9   : > { %v1461_v10 = vpop.eup %1460  ;;  %v1013_v55 = vmul.f32 1.442695, %v987_v15 }
 0x1ea   : > { %v1052_v1 = vsel %vm928_vm2, %v1461_v10, 0.0 }
 0x1eb   : > { %1462 = vpow2.f32 %v1013_v55  ;;  %1053 = vadd.xlane.f32.xlu1 %v1052_v1 }
 0x1ee   : > { %v2070_v59 = vpop.xlane.xlu2 %963 }
 0x1ef   : > { %v988_v25 = vsub.f32 %v1943_v52, %v2070_v59 }
 0x1f1   : > { %v1463_v58 = vpop.eup %1462  ;;  %v1015_v44 = vmul.f32 1.442695, %v988_v25 }
 0x1f2   : > { %v1055_v21 = vsel %vm928_vm2, %v1463_v58, 0.0 }
 0x1f3   : > { %1464 = vpow2.f32 %v1015_v44  ;;  %1056 = vadd.xlane.f32.xlu2 %v1055_v21 }
 0x1f9   : > { %v1465_v14 = vpop.eup %1464 }
 0x1fa   : > { %v1058_v16 = vsel %vm928_vm2, %v1465_v14, 0.0 }
 0x1fb   : > { %1059 = vadd.xlane.f32.xlu0 %v1058_v16 }
 0x216   : > { %v1027_v53 = vpop.xlane.xlu1 %1026  ;;  %v2076_v34 = vpop.xlane.xlu0 %966 }
 0x217   : > { %1466 = vlog2.f32 %v1027_v53  ;;  %v989_v38 = vsub.f32 %v1975_v20, %v2076_v34 }
 0x219   : > { %v1017_v5 = vmul.f32 1.442695, %v989_v38  ;;  %v1180_v38 = vmul.f32 %v1943_v52, %v1809_v13 }
 0x21b   : > { %1468 = vpow2.f32 %v1017_v5  ;;  %v1218_v52 = vsel %vm928_vm2, %v1180_v38, 0.0 }
 0x21d   : > { %v1467_v43 = vpop.eup %1466 }
 0x21e   : > { %v1074_v39 = vmul.f32 0.6931472, %v1467_v43  ;;  %v2080_v60 = vpop.xlane.xlu1 %969 }
 0x21f   : > { %v990_v41 = vsub.f32 %v1992_v9, %v2080_v60 }
 0x220   : > { %v1105_v51 = vadd.f32 %v1074_v39, %v1963_v8 }
 0x221   : > { %v1469_v15 = vpop.eup %1468  ;;  %v1019_v10 = vmul.f32 1.442695, %v990_v41 }
 0x222   : > { %v1233_v55 = vsub.f32 %v1105_v51, %v1970_v19  ;;  %v1061_v1 = vsel %vm928_vm2, %v1469_v15, 0.0 }
 0x223   : > { %1470 = vpow2.f32 %v1019_v10  ;;  %1062 = vadd.xlane.f32.xlu1 %v1061_v1 }
 0x224   : > { %v1249_v25 = vmul.f32 %v1233_v55, %v1935_v42 }
 0x226   : > { %1266 = vst.msk [vmem:[%s2091_s23] sm:$0xff] %vm1265_vm4, %v1249_v25  ;;  %v1030_v8 = vpop.xlane.xlu2 %1029  ;;  %v2096_v58 = vpop.xlane.xlu1 %1207 }
 0x227   : > { %1472 = vlog2.f32 %v1030_v8 }
 0x228   : > { %v1033_v19 = vpop.xlane.xlu0 %1032 }
 0x229   : > { %v1471_v44 = vpop.eup %1470  ;;  %1474 = vlog2.f32 %v1033_v19 }
 0x22a   : > { %v1064_v21 = vsel %vm928_vm2, %v1471_v44, 0.0 }
 0x22b   : > { %1065 = vadd.xlane.f32.xlu2 %v1064_v21 }
 0x22d   : > { %v1473_v14 = vpop.eup %1472 }
 0x22e   : > { %v1076_v16 = vmul.f32 0.6931472, %v1473_v14  ;;  %v2099_v53 = vpop.xlane.xlu2 %972 }
 0x22f   : > { %v1475_v42 = vpop.eup %1474  ;;  %v991_v5 = vsub.f32 %v2013_v61, %v2099_v53 }
 0x230   : > { %v1106_v43 = vadd.f32 %v1076_v16, %v1983_v40  ;;  %v1078_v39 = vmul.f32 0.6931472, %v1475_v42  ;;  %v1036_v41 = vpop.xlane.xlu1 %1035  ;;  %v2106_v51 = vpop.xlane.xlu0 %975 }
 0x231   : > { %v1021_v15 = vmul.f32 1.442695, %v991_v5  ;;  %1476 = vlog2.f32 %v1036_v41  ;;  %v992_v10 = vsub.f32 %v2015_v11, %v2106_v51  ;;  %v1181_v5 = vmul.f32 %v1975_v20, %v1826_v29 }
 0x232   : > { %v1234_v55 = vsub.f32 %v1106_v43, %v1973_v24  ;;  %v1107_v13 = vadd.f32 %v1078_v39, %v1988_v48  ;;  %v1183_v24 = vmul.f32 %v2013_v61, %v1823_v28  ;;  %v1179_v43 = vmul.f32 %v1931_v35, %v1778_v46 }
 0x233   : > { %1478 = vpow2.f32 %v1021_v15  ;;  %v1023_v1 = vmul.f32 1.442695, %v992_v10  ;;  %1219 = vadd.xlane.f32.xlu2 %v1218_v52  ;;  %v1221_v39 = vsel %vm928_vm2, %v1181_v5, 0.0  ;;  %v1182_v20 = vmul.f32 %v1992_v9, %v1801_v7 }
 0x234   : > { %v1250_v40 = vmul.f32 %v1234_v55, %v1917_v17  ;;  %v1235_v25 = vsub.f32 %v1107_v13, %v1996_v4  ;;  %v1227_v4 = vsel %vm928_vm2, %v1183_v24, 0.0 }
 0x235   : > { %1480 = vpow2.f32 %v1023_v1  ;;  %v1224_v35 = vsel %vm928_vm2, %v1182_v20, 0.0 }
 0x236   : > { %1267 = vst.msk [vmem:[%s2091_s23 + $0x8] sm:$0xff] %vm1265_vm4, %v1250_v40  ;;  %v1251_v8 = vmul.f32 %v1235_v25, %v1926_v31  ;;  %v1202_v19 = vpop.xlane.xlu2 %1201 }
 0x237   : > { %v1477_v44 = vpop.eup %1476 }
 0x238   : > { %1268 = vst.msk [vmem:[%s2091_s23 + $0x10] sm:$0xff] %vm1265_vm4, %v1251_v8  ;;  %v1080_v48 = vmul.f32 0.6931472, %v1477_v44  ;;  %v1205_v21 = vpop.xlane.xlu0 %1204 }
 0x239   : > { %v1479_v14 = vpop.eup %1478 }
 0x23a   : > { %v1108_v17 = vadd.f32 %v1080_v48, %v2000_v22  ;;  %v1067_v16 = vsel %vm928_vm2, %v1479_v14, 0.0 }
 0x23b   : > { %v1481_v38 = vpop.eup %1480  ;;  %1228 = vadd.xlane.f32.xlu2 %v1227_v4  ;;  %1068 = vadd.xlane.f32.xlu0 %v1067_v16 }
 0x23c   : > { %v1236_v31 = vsub.f32 %v1108_v17, %v2022_v23  ;;  %v1070_v28 = vsel %vm928_vm2, %v1481_v38, 0.0  ;;  %v1215_v23 = vsel %vm928_vm2, %v1179_v43, 0.0 }
 0x23d   : > { %1071 = vadd.xlane.f32.xlu1 %v1070_v28 }
 0x23e   : > { %v1252_v61 = vmul.f32 %v1236_v31, %v1947_v54  ;;  %v1211_v42 = vpop.xlane.xlu2 %1210  ;;  %v1184_v54 = vmul.f32 %v2015_v11, %v1834_v37 }
 0x240   : > { %1269 = vst.msk [vmem:[%s2091_s23 + $0x18] sm:$0xff] %vm1265_vm4, %v1252_v61  ;;  %v1214_v22 = vpop.xlane.xlu0 %1213  ;;  %v1230_v46 = vsel %vm928_vm2, %v1184_v54, 0.0 }
 0x243   : > { %1222 = vadd.xlane.f32.xlu0 %v1221_v39 }
 0x245   : > { %1216 = vadd.xlane.f32.xlu1 %v1215_v23 }
 0x246   : > { %v1039_v41 = vpop.xlane.xlu2 %1038  ;;  %v1045_v15 = vpop.xlane.xlu1 %1044 }
 0x247   : > { %1482 = vlog2.f32 %v1039_v41 }
 0x248   : > { %1484 = vlog2.f32 %v1045_v15  ;;  %v1042_v29 = vpop.xlane.xlu0 %1041 }
 0x249   : > { %1486 = vlog2.f32 %v1042_v29 }
 0x24b   : > { %1231 = vadd.xlane.f32.xlu0 %v1230_v46 }
 0x24d   : > { %v1483_v10 = vpop.eup %1482  ;;  %1225 = vadd.xlane.f32.xlu1 %v1224_v35 }
 0x24e   : > { %v1485_v55 = vpop.eup %1484  ;;  %v1082_v13 = vmul.f32 0.6931472, %v1483_v10  ;;  %v1048_v52 = vpop.xlane.xlu2 %1047 }
 0x24f   : > { %v1487_v1 = vpop.eup %1486  ;;  %v1086_v37 = vmul.f32 0.6931472, %v1485_v55  ;;  %1488 = vlog2.f32 %v1048_v52 }
 0x250   : > { %v1109_v11 = vadd.f32 %v1082_v13, %v2010_v30  ;;  %v1084_v7 = vmul.f32 0.6931472, %v1487_v1 }
 0x251   : > { %v1111_v9 = vadd.f32 %v1086_v37, %v2038_v47 }
 0x252   : > { %v1237_v40 = vsub.f32 %v1109_v11, %v2036_v26  ;;  %v1110_v25 = vadd.f32 %v1084_v7, %v2026_v27 }
 0x253   : > { %v1239_v8 = vsub.f32 %v1111_v9, %v1205_v21 }
 0x254   : > { %v1253_v24 = vmul.f32 %v1237_v40, %v1929_v32  ;;  %v1238_v44 = vsub.f32 %v1110_v25, %v1202_v19 }
 0x255   : > { %v1489_v48 = vpop.eup %1488  ;;  %v1255_v14 = vmul.f32 %v1239_v8, %v1953_v62 }
 0x256   : > { %1270 = vst.msk [vmem:[%s2091_s23 + $0x20] sm:$0xff] %vm1265_vm4, %v1253_v24  ;;  %v1254_v30 = vmul.f32 %v1238_v44, %v1939_v49  ;;  %v1088_v17 = vmul.f32 0.6931472, %v1489_v48  ;;  %v1051_v4 = vpop.xlane.xlu0 %1050 }
 0x257   : > { %1272 = vst.msk [vmem:[%s2091_s23 + $0x30] sm:$0xff] %vm1265_vm4, %v1255_v14  ;;  %1490 = vlog2.f32 %v1051_v4 }
 0x258   : > { %1271 = vst.msk [vmem:[%s2091_s23 + $0x28] sm:$0xff] %vm1265_vm4, %v1254_v30  ;;  %v1112_v27 = vadd.f32 %v1088_v17, %v2048_v18 }
 0x25a   : > { %v1240_v32 = vsub.f32 %v1112_v27, %v2096_v58 }
 0x25c   : > { %v1256_v26 = vmul.f32 %v1240_v32, %v1941_v50 }
 0x25d   : > { %v1491_v62 = vpop.eup %1490 }
 0x25e   : > { %1273 = vst.msk [vmem:[%s2091_s23 + $0x38] sm:$0xff] %vm1265_vm4, %v1256_v26  ;;  %v1090_v47 = vmul.f32 0.6931472, %v1491_v62  ;;  %v1054_v49 = vpop.xlane.xlu1 %1053 }
 0x25f   : > { %1492 = vlog2.f32 %v1054_v49 }
 0x260   : > { %v1113_v19 = vadd.f32 %v1090_v47, %v2055_v36 }
 0x262   : > { %v1241_v21 = vsub.f32 %v1113_v19, %v1211_v42 }
 0x264   : > { %v1257_v16 = vmul.f32 %v1241_v21, %v1949_v56 }
 0x265   : > { %v1493_v38 = vpop.eup %1492 }
 0x266   : > { %1274 = vst.msk [vmem:[%s2091_s23 + $0x40] sm:$0xff] %vm1265_vm4, %v1257_v16  ;;  %v1092_v18 = vmul.f32 0.6931472, %v1493_v38  ;;  %v1057_v61 = vpop.xlane.xlu2 %1056 }
 0x268   : > { %v1114_v58 = vadd.f32 %v1092_v18, %v2060_v45 }
 0x26a   : > { %v1242_v31 = vsub.f32 %v1114_v58, %v1214_v22 }
 0x26c   : > { %v1258_v50 = vmul.f32 %v1242_v31, %v1959_v3 }
 0x26e   : > { %1275 = vst.msk [vmem:[%s2091_s23 + $0x48] sm:$0xff] %vm1265_vm4, %v1258_v50  ;;  %v1060_v28 = vpop.xlane.xlu0 %1059 }
 0x26f   : > { %1494 = vlog2.f32 %v1060_v28 }
 0x275   : > { %v1495_v5 = vpop.eup %1494 }
 0x276   : > { %v1096_v42 = vmul.f32 0.6931472, %v1495_v5 }
 0x278   : > { %v1116_v56 = vadd.f32 %v1096_v42, %v2070_v59 }
 0x296   : > { %v1063_v43 = vpop.xlane.xlu1 %1062 }
 0x297   : > { %1496 = vlog2.f32 %v1063_v43 }
 0x298   : > { %1498 = vlog2.f32 %v1057_v61 }
 0x29d   : > { %v1497_v3 = vpop.eup %1496 }
 0x29e   : > { %v1066_v36 = vpop.xlane.xlu2 %1065  ;;  %v1499_v41 = vpop.eup %1498  ;;  %v1098_v54 = vmul.f32 0.6931472, %v1497_v3 }
 0x29f   : > { %v1094_v29 = vmul.f32 0.6931472, %v1499_v41 }
 0x2a0   : > { %v1117_v59 = vadd.f32 %v1098_v54, %v2076_v34 }
 0x2a1   : > { %v1115_v55 = vadd.f32 %v1094_v29, %v2065_v2 }
 0x2a6   : > { %v1220_v39 = vpop.xlane.xlu2 %1219 }
 0x2a7   : > { %v1244_v23 = vsub.f32 %v1116_v56, %v1220_v39 }
 0x2a9   : > { %v1260_v45 = vmul.f32 %v1244_v23, %v1955_v63 }
 0x2ab   : > { %1277 = vst.msk [vmem:[%s2091_s23 + $0x58] sm:$0xff] %vm1265_vm4, %v1260_v45 }
 0x2ae   : > { %v1069_v22 = vpop.xlane.xlu0 %1068  ;;  %v1229_v37 = vpop.xlane.xlu2 %1228 }
 0x2af   : > { %1500 = vlog2.f32 %v1069_v22 }
 0x2b0   : > { %v1072_v15 = vpop.xlane.xlu1 %1071 }
 0x2b1   : > { %1502 = vlog2.f32 %v1072_v15 }
 0x2b2   : > { %1504 = vlog2.f32 %v1066_v36 }
 0x2b5   : > { %v1501_v20 = vpop.eup %1500 }
 0x2b6   : > { %v1102_v46 = vmul.f32 0.6931472, %v1501_v20  ;;  %v1223_v35 = vpop.xlane.xlu0 %1222 }
 0x2b7   : > { %v1503_v63 = vpop.eup %1502  ;;  %v1245_v10 = vsub.f32 %v1117_v59, %v1223_v35 }
 0x2b8   : > { %v1505_v13 = vpop.eup %1504  ;;  %v1119_v52 = vadd.f32 %v1102_v46, %v2099_v53  ;;  %v1217_v1 = vpop.xlane.xlu1 %1216  ;;  %v1104_v11 = vmul.f32 0.6931472, %v1503_v63 }
 0x2b9   : > { %v1261_v7 = vmul.f32 %v1245_v10, %v1967_v12  ;;  %v1243_v9 = vsub.f32 %v1115_v55, %v1217_v1  ;;  %v1100_v34 = vmul.f32 0.6931472, %v1505_v13 }
 0x2ba   : > { %v1247_v40 = vsub.f32 %v1119_v52, %v1229_v37  ;;  %v1120_v2 = vadd.f32 %v1104_v11, %v2106_v51 }
 0x2bb   : > { %1278 = vst.msk [vmem:[%s2091_s23 + $0x60] sm:$0xff] %vm1265_vm4, %v1261_v7  ;;  %v1259_v25 = vmul.f32 %v1243_v9, %v1951_v57  ;;  %v1118_v12 = vadd.f32 %v1100_v34, %v2080_v60 }
 0x2bc   : > { %v1263_v8 = vmul.f32 %v1247_v40, %v1961_v6 }
 0x2bd   : > { %1276 = vst.msk [vmem:[%s2091_s23 + $0x50] sm:$0xff] %vm1265_vm4, %v1259_v25 }
 0x2be   : > { %1280 = vst.msk [vmem:[%s2091_s23 + $0x70] sm:$0xff] %vm1265_vm4, %v1263_v8  ;;  %v1232_v53 = vpop.xlane.xlu0 %1231 }
 0x2bf   : > { %v1248_v24 = vsub.f32 %v1120_v2, %v1232_v53 }
 0x2c0   : > { %v1226_v44 = vpop.xlane.xlu1 %1225 }
 0x2c1   : > { %v1264_v48 = vmul.f32 %v1248_v24, %v1980_v33  ;;  %v1246_v14 = vsub.f32 %v1118_v12, %v1226_v44 }
 0x2c3   : > { %1281 = vst.msk [vmem:[%s2091_s23 + $0x78] sm:$0xff] %vm1265_vm4, %v1264_v48  ;;  %v1262_v57 = vmul.f32 %v1246_v14, %v1957_v0 }
 0x2c5   : > { %1279 = vst.msk [vmem:[%s2091_s23 + $0x68] sm:$0xff] %vm1265_vm4, %v1262_v57 }
 0x2c6 PF: > { %s18_s27 = sadd.s32 1, %s1512_s27  }
 0x2c7   : > { %p15_p4 = scmp.ge.s32.totalorder %s18_s27, 5  }
 0x2c9   :  { %17 = sbr.rel (!%p15_p4) target bundleno = 1 (0x1), region = 85 }

</bundles_post_ra>
